<compile_context>
chip_gen: v6e
topology: v6e:2x2x1
jax: 0.10.0
libtpu: 0.0.40
codegen_flags: <defaults>
</compile_context>

<pallas_src>
import functools

import jax
import jax.numpy as jnp
from jax.experimental import pallas as pl
from jax.experimental.pallas import tpu as pltpu


def _mha_map_kernel(q_ref, k_ref, wq_ref, bq_ref, wk_ref, bk_ref, out_ref,
                    *scratch, num_heads, head_dim, hw, hw_pad, norm_fact,
                    matmul_dtype):
    # q_ref : [TQ, C]        k_ref : [C, HW]
    # wq    : [C, D]         bq    : [1, D]
    # wk    : [D, C]         bk    : [D, 1]
    # out   : [TQ, N*HW_pad] scratch (only if out dtype != f32): same, f32
    md = matmul_dtype
    q = q_ref[...]                                            # [TQ, C]
    kf = k_ref[...]                                           # [C, HW]

    # q_linear: [TQ, C] @ [C, D] -> [TQ, D]  (f32 accumulate, bias+scale f32)
    qp = jnp.dot(q.astype(md), wq_ref[...].astype(md),
                 preferred_element_type=jnp.float32) + bq_ref[...]
    qp = qp * norm_fact
    # 1x1 conv == per-pixel linear: [D, C] @ [C, HW] -> [D, HW]; bias [D, 1]
    # broadcasts over lanes.  No transpose of k anywhere.
    kp = jnp.dot(wk_ref[...].astype(md), kf.astype(md),
                 preferred_element_type=jnp.float32) + bk_ref[...]

    qh_all = qp.astype(md)                                    # [TQ, D]
    kh_all = kp.astype(md)                                    # [D, HW]

    # Logits buffer: out block itself when it is f32 (review: drop the extra
    # scratch + extra vst/vld pass), else an f32 VMEM scratch.
    buf = scratch[0] if scratch else out_ref
    tq = q.shape[0]
    pad = hw_pad - hw

    # Pass 1: per-head logits stored head-major at 128-aligned lane offsets,
    # with online (running) row max / sum accumulated per head block so no
    # full-width exp temporary is ever materialized.
    # NOTE(review item 9/10): per-head matmuls (depth=head_dim) and the
    # non-128-aligned qp lane slices are left as-is -- the kernel is
    # memory-bound; revisit only if the bundle dump shows MXU/relayout binding.
    m = jnp.full((tq, 1), -jnp.inf, jnp.float32)
    l = jnp.zeros((tq, 1), jnp.float32)
    for n in range(num_heads):
        qh = qh_all[:, n * head_dim:(n + 1) * head_dim]       # [TQ, hd]
        kh = kh_all[n * head_dim:(n + 1) * head_dim, :]       # [hd, HW]
        logit = jnp.dot(qh, kh, preferred_element_type=jnp.float32)  # [TQ, HW]
        buf[:, n * hw_pad:n * hw_pad + hw] = logit
        if pad:
            buf[:, n * hw_pad + hw:(n + 1) * hw_pad] = jnp.full(
                (tq, pad), -jnp.inf, jnp.float32)
        bm = jnp.max(logit, axis=-1, keepdims=True)
        m_new = jnp.maximum(m, bm)
        l = l * jnp.exp(m - m_new) + jnp.sum(jnp.exp(logit - m_new),
                                             axis=-1, keepdims=True)
        m = m_new

    # Pass 2: write exp(x - m) * (1/l) per head block (lane-dense aligned
    # stores of width hw_pad).  Pad lanes hold -inf -> exp == 0.
    inv = pl.reciprocal(l, approx=True)                       # EUP slot
    for n in range(num_heads):
        blk = buf[:, n * hw_pad:(n + 1) * hw_pad]             # [TQ, HW_pad] f32
        out_ref[:, n * hw_pad:(n + 1) * hw_pad] = (
            jnp.exp(blk - m) * inv).astype(out_ref.dtype)
    # dropout=0.0 -> identity.


def mh_attention_map(q, k, wq, bq, wk, bk, num_heads, *, mask=None,
                     matmul_dtype=jnp.bfloat16, out_dtype=jnp.bfloat16,
                     q_tile=16):
    """q: [B, Q, C] f32, k: [B, C, H, W] f32 (NCHW), wq/wk: [D, C], bq/bk: [D]."""
    assert mask is None, "mask argument is not supported by this Pallas kernel"
    B, Q, C = q.shape
    Bk, Ck, H, W = k.shape
    assert Bk == B and Ck == C
    D = wq.shape[0]
    assert D % num_heads == 0
    assert q_tile % 8 == 0
    hd = D // num_heads
    HW = H * W
    HWp = ((HW + 127) // 128) * 128          # per-head lane-aligned width
    NHWp = num_heads * HWp
    norm_fact = float(D / num_heads) ** (-0.5)

    # Q tiling: tile size is a multiple of 8 (sublane), Q padded up to a
    # multiple of it.  Padded rows are harmless (discarded in the wrapper).
    tq = min(q_tile, ((Q + 7) // 8) * 8)
    Qp = ((Q + tq - 1) // tq) * tq
    nq = Qp // tq

    # Layout glue -- no large transposes:
    q_in = q if Qp == Q else jnp.pad(q, ((0, 0), (0, Qp - Q), (0, 0)))
    kflat = k.reshape(B, C, HW)      # pure reshape, h-major (torch flatten order)
    wq_t = wq.T                      # tiny [D, C] -> [C, D] parameter transpose
    bq2 = bq.reshape(1, D)
    bk2 = bk.reshape(D, 1)

    out_itemsize = jnp.dtype(out_dtype).itemsize
    use_scratch = jnp.dtype(out_dtype) != jnp.dtype(jnp.float32)
    scratch_shapes = ([pltpu.VMEM((tq, NHWp), jnp.float32)]
                      if use_scratch else [])

    kernel = functools.partial(_mha_map_kernel, num_heads=num_heads,
                               head_dim=hd, hw=HW, hw_pad=HWp,
                               norm_fact=norm_fact, matmul_dtype=matmul_dtype)

    cost = pl.CostEstimate(
        flops=int(2 * B * (Qp * C * D + nq * D * C * HW + Qp * D * HW)),
        transcendentals=int(2 * B * Qp * num_heads * HW),
        bytes_accessed=int(B * Qp * C * 4 + B * C * HW * 4
                           + (C * D + D * C + 2 * D) * 4
                           + B * Qp * NHWp * out_itemsize),
    )

    out = pl.pallas_call(
        kernel,
        out_shape=jax.ShapeDtypeStruct((B, Qp, NHWp), out_dtype),
        grid=(B, nq),
        in_specs=[
            pl.BlockSpec((None, tq, C), lambda b, qi: (b, qi, 0)),
            pl.BlockSpec((None, C, HW), lambda b, qi: (b, 0, 0)),
            pl.BlockSpec((C, D), lambda b, qi: (0, 0)),
            pl.BlockSpec((1, D), lambda b, qi: (0, 0)),
            pl.BlockSpec((D, C), lambda b, qi: (0, 0)),
            pl.BlockSpec((D, 1), lambda b, qi: (0, 0)),
        ],
        out_specs=pl.BlockSpec((None, tq, NHWp), lambda b, qi: (b, qi, 0)),
        scratch_shapes=scratch_shapes,
        compiler_params=pltpu.CompilerParams(
            # Both axes parallel: kp is recomputed per Q tile (cheap vs memory
            # traffic) so Q tiles are independent -> megacore-splittable and
            # pipelineable even at B=1.
            dimension_semantics=("parallel", "parallel"),
            # Safe on every generation (v7x physical VMEM is 64 MiB).
            vmem_limit_bytes=48 * 1024 * 1024,
        ),
        cost_estimate=cost,
    )(q_in, kflat, wq_t, bq2, wk, bk2)

    # Head-major, lane-padded layout back to [B, Q, N, H, W]; slicing only
    # happens when padding was actually inserted.
    out = out.reshape(B, Qp, num_heads, HWp)
    if Qp != Q or HWp != HW:
        out = out[:, :Q, :, :HW]
    return out.reshape(B, Q, num_heads, H, W)


def _reference_forward(q, k, wq, bq, wk, bk, num_heads):
    """Plain-JAX replica of the PyTorch forward (mask=None, dropout=0)."""
    B, Q, C = q.shape
    D = wq.shape[0]
    hd = D // num_heads
    norm_fact = float(D / num_heads) ** (-0.5)
    qp = q @ wq.T + bq
    kp = jnp.einsum('bchw,dc->bdhw', k, wk) + bk[None, :, None, None]
    qh = qp.reshape(B, Q, num_heads, hd)
    kh = kp.reshape(B, num_heads, hd, k.shape[-2], k.shape[-1])
    w = jnp.einsum('bqnc,bnchw->bqnhw', qh * norm_fact, kh)
    wf = jax.nn.softmax(w.reshape(B, Q, -1), axis=-1)
    return wf.reshape(w.shape)


if __name__ == "__main__":
    def run_case(B, Q, C, D, N, H, W, key):
        kq, kk, kwq, kwk = jax.random.split(key, 4)
        q = jax.random.normal(kq, (B, Q, C), dtype=jnp.float32)
        k = jax.random.normal(kk, (B, C, H, W), dtype=jnp.float32)
        # Deterministic parameter init matching the module's __init__:
        # xavier_uniform_ weights [D, C], zero biases.
        bound = (6.0 / (C + D)) ** 0.5
        wq = jax.random.uniform(kwq, (D, C), minval=-bound, maxval=bound,
                                dtype=jnp.float32)
        wk = jax.random.uniform(kwk, (D, C), minval=-bound, maxval=bound,
                                dtype=jnp.float32)
        bq = jnp.zeros((D,), dtype=jnp.float32)
        bk = jnp.zeros((D,), dtype=jnp.float32)

        ref = _reference_forward(q, k, wq, bq, wk, bk, num_heads=N)

        # Exact-ish path: f32 matmuls + f32 output (softmax done in the out
        # block, no logits scratch).
        out_f32 = mh_attention_map(q, k, wq, bq, wk, bk, num_heads=N,
                                   matmul_dtype=jnp.float32,
                                   out_dtype=jnp.float32)
        # Fast (default) path: bf16 MXU inputs + bf16 output.
        out_fast = mh_attention_map(q, k, wq, bq, wk, bk, num_heads=N)
        jax.block_until_ready((out_f32, out_fast))

        assert out_f32.shape == (B, Q, N, H, W)
        assert out_fast.shape == (B, Q, N, H, W)
        assert jnp.allclose(out_f32, ref, atol=2e-3, rtol=2e-3), "f32 mismatch"
        assert jnp.allclose(out_fast.astype(jnp.float32), ref,
                            atol=3e-2, rtol=3e-2), "bf16 mismatch"

    key = jax.random.PRNGKey(0)
    k1, k2 = jax.random.split(key)
    # Lane-aligned case: query_dim=32, hidden_dim=32, heads=4 (hd=8), 16x16 map.
    run_case(B=2, Q=8, C=32, D=32, N=4, H=16, W=16, key=k1)
    # Padding path: 10x10 map (HW=100 -> padded to 128 lanes/head), Q=5 -> 8.
    run_case(B=1, Q=5, C=32, D=32, N=4, H=10, W=10, key=k2)
    print("KERNEL_OK")
</pallas_src>

<mosaic_0001>
module attributes {stable_mosaic.version = 11 : i64} {
  func.func @_mha_map_kernel(%arg0: i32, %arg1: i32, %arg2: memref<1x8x32xf32, #tpu.memory_space<vmem>>, %arg3: memref<1x32x256xf32, #tpu.memory_space<vmem>>, %arg4: memref<32x32xf32, #tpu.memory_space<vmem>>, %arg5: memref<1x32xf32, #tpu.memory_space<vmem>>, %arg6: memref<32x32xf32, #tpu.memory_space<vmem>>, %arg7: memref<32x1xf32, #tpu.memory_space<vmem>>, %arg8: memref<1x8x1024xf32, #tpu.memory_space<vmem>>) attributes {dimension_semantics = [#tpu.dimension_semantics<parallel>, #tpu.dimension_semantics<parallel>], iteration_bounds = array<i64: 2, 1>, scalar_prefetch = 0 : i64, scratch_operands = 0 : i64, tpu.core_type = #tpu.core_type<tc>, window_params = [{transform_indices = @transform_0, window_bounds = array<i64: 1, 8, 32>}, {transform_indices = @transform_1, window_bounds = array<i64: 1, 32, 256>}, {pipeline_mode = #tpu.pipeline_mode<synchronous>, transform_indices = @transform_2, window_bounds = array<i64: 32, 32>}, {pipeline_mode = #tpu.pipeline_mode<synchronous>, transform_indices = @transform_3, window_bounds = array<i64: 1, 32>}, {pipeline_mode = #tpu.pipeline_mode<synchronous>, transform_indices = @transform_4, window_bounds = array<i64: 32, 32>}, {pipeline_mode = #tpu.pipeline_mode<synchronous>, transform_indices = @transform_5, window_bounds = array<i64: 32, 1>}, {transform_indices = @transform_6, window_bounds = array<i64: 1, 8, 1024>}]} {
    %c0 = arith.constant 0 : index
    %c0_0 = arith.constant 0 : index
    %c0_1 = arith.constant 0 : index
    %0 = vector.load %arg2[%c0, %c0_0, %c0_1] : memref<1x8x32xf32, #tpu.memory_space<vmem>>, vector<1x8x32xf32>
    %1 = vector.shape_cast %0 : vector<1x8x32xf32> to vector<8x32xf32>
    %c0_2 = arith.constant 0 : index
    %c0_3 = arith.constant 0 : index
    %c0_4 = arith.constant 0 : index
    %2 = vector.load %arg3[%c0_2, %c0_3, %c0_4] : memref<1x32x256xf32, #tpu.memory_space<vmem>>, vector<1x32x256xf32>
    %3 = vector.shape_cast %2 : vector<1x32x256xf32> to vector<32x256xf32>
    %c0_5 = arith.constant 0 : index
    %c0_6 = arith.constant 0 : index
    %4 = vector.load %arg4[%c0_5, %c0_6] : memref<32x32xf32, #tpu.memory_space<vmem>>, vector<32x32xf32>
    %cst = arith.constant dense<0.000000e+00> : vector<8x32xf32>
    %5 = tpu.matmul %1, %4, %cst {dimension_numbers = #tpu.dot_dimension_numbers<[1], [0], [0], [1], [0, 0, 1, 1], [], []>} : vector<8x32xf32>, vector<32x32xf32>, vector<8x32xf32> -> vector<8x32xf32>
    %c0_7 = arith.constant 0 : index
    %c0_8 = arith.constant 0 : index
    %6 = vector.load %arg5[%c0_7, %c0_8] : memref<1x32xf32, #tpu.memory_space<vmem>>, vector<1x32xf32>
    %7 = vector.broadcast %6 : vector<1x32xf32> to vector<8x32xf32>
    %8 = arith.addf %5, %7 : vector<8x32xf32>
    %cst_9 = arith.constant 0.353553385 : f32
    %9 = vector.broadcast %cst_9 : f32 to vector<8x32xf32>
    %10 = arith.mulf %8, %9 : vector<8x32xf32>
    %c0_10 = arith.constant 0 : index
    %c0_11 = arith.constant 0 : index
    %11 = vector.load %arg6[%c0_10, %c0_11] : memref<32x32xf32, #tpu.memory_space<vmem>>, vector<32x32xf32>
    %cst_12 = arith.constant dense<0.000000e+00> : vector<32x256xf32>
    %12 = tpu.matmul %11, %3, %cst_12 {dimension_numbers = #tpu.dot_dimension_numbers<[1], [0], [0], [1], [0, 0, 1, 1], [], []>} : vector<32x32xf32>, vector<32x256xf32>, vector<32x256xf32> -> vector<32x256xf32>
    %c0_13 = arith.constant 0 : index
    %c0_14 = arith.constant 0 : index
    %13 = vector.load %arg7[%c0_13, %c0_14] : memref<32x1xf32, #tpu.memory_space<vmem>>, vector<32x1xf32>
    %14 = vector.broadcast %13 : vector<32x1xf32> to vector<32x256xf32>
    %15 = arith.addf %12, %14 : vector<32x256xf32>
    %cst_15 = arith.constant 0xFF800000 : f32
    %16 = vector.broadcast %cst_15 : f32 to vector<8x1xf32>
    %cst_16 = arith.constant 0.000000e+00 : f32
    %17 = vector.broadcast %cst_16 : f32 to vector<8x1xf32>
    %18 = vector.extract_strided_slice %10 {offsets = [0, 0], sizes = [8, 8], strides = [1, 1]} : vector<8x32xf32> to vector<8x8xf32>
    %19 = vector.extract_strided_slice %15 {offsets = [0, 0], sizes = [8, 256], strides = [1, 1]} : vector<32x256xf32> to vector<8x256xf32>
    %cst_17 = arith.constant dense<0.000000e+00> : vector<8x256xf32>
    %20 = tpu.matmul %18, %19, %cst_17 {dimension_numbers = #tpu.dot_dimension_numbers<[1], [0], [0], [1], [0, 0, 1, 1], [], []>} : vector<8x8xf32>, vector<8x256xf32>, vector<8x256xf32> -> vector<8x256xf32>
    %c0_18 = arith.constant 0 : index
    %c0_19 = arith.constant 0 : index
    %c0_20 = arith.constant 0 : index
    %21 = vector.load %arg8[%c0_18, %c0_19, %c0_20] : memref<1x8x1024xf32, #tpu.memory_space<vmem>>, vector<1x8x256xf32>
    %22 = vector.shape_cast %21 : vector<1x8x256xf32> to vector<8x256xf32>
    %23 = vector.shape_cast %20 : vector<8x256xf32> to vector<1x8x256xf32>
    tpu.vector_store %arg8[%c0_18, %c0_19, %c0_20], %23 {strides = array<i32>} : memref<1x8x1024xf32, #tpu.memory_space<vmem>>, vector<1x8x256xf32>,
    %cst_21 = arith.constant dense<0xFF800000> : vector<8xf32>
    %24 = vector.multi_reduction <maximumf>, %20, %cst_21 [1] : vector<8x256xf32> to vector<8xf32>
    %25 = vector.shape_cast %24 : vector<8xf32> to vector<8x1xf32>
    %26 = arith.maximumf %16, %25 : vector<8x1xf32>
    %27 = arith.subf %16, %26 : vector<8x1xf32>
    %28 = math.exp %27 : vector<8x1xf32>
    %29 = arith.mulf %17, %28 : vector<8x1xf32>
    %30 = vector.broadcast %26 : vector<8x1xf32> to vector<8x256xf32>
    %31 = arith.subf %20, %30 : vector<8x256xf32>
    %32 = math.exp %31 : vector<8x256xf32>
    %cst_22 = arith.constant dense<0.000000e+00> : vector<8xf32>
    %33 = vector.multi_reduction <add>, %32, %cst_22 [1] : vector<8x256xf32> to vector<8xf32>
    %34 = vector.shape_cast %33 : vector<8xf32> to vector<8x1xf32>
    %35 = arith.addf %29, %34 : vector<8x1xf32>
    %36 = vector.extract_strided_slice %10 {offsets = [0, 8], sizes = [8, 8], strides = [1, 1]} : vector<8x32xf32> to vector<8x8xf32>
    %37 = vector.extract_strided_slice %15 {offsets = [8, 0], sizes = [8, 256], strides = [1, 1]} : vector<32x256xf32> to vector<8x256xf32>
    %cst_23 = arith.constant dense<0.000000e+00> : vector<8x256xf32>
    %38 = tpu.matmul %36, %37, %cst_23 {dimension_numbers = #tpu.dot_dimension_numbers<[1], [0], [0], [1], [0, 0, 1, 1], [], []>} : vector<8x8xf32>, vector<8x256xf32>, vector<8x256xf32> -> vector<8x256xf32>
    %c0_24 = arith.constant 0 : index
    %c0_25 = arith.constant 0 : index
    %c256 = arith.constant 256 : index
    %39 = vector.load %arg8[%c0_24, %c0_25, %c256] : memref<1x8x1024xf32, #tpu.memory_space<vmem>>, vector<1x8x256xf32>
    %40 = vector.shape_cast %39 : vector<1x8x256xf32> to vector<8x256xf32>
    %41 = vector.shape_cast %38 : vector<8x256xf32> to vector<1x8x256xf32>
    tpu.vector_store %arg8[%c0_24, %c0_25, %c256], %41 {strides = array<i32>} : memref<1x8x1024xf32, #tpu.memory_space<vmem>>, vector<1x8x256xf32>,
    %cst_26 = arith.constant dense<0xFF800000> : vector<8xf32>
    %42 = vector.multi_reduction <maximumf>, %38, %cst_26 [1] : vector<8x256xf32> to vector<8xf32>
    %43 = vector.shape_cast %42 : vector<8xf32> to vector<8x1xf32>
    %44 = arith.maximumf %26, %43 : vector<8x1xf32>
    %45 = arith.subf %26, %44 : vector<8x1xf32>
    %46 = math.exp %45 : vector<8x1xf32>
    %47 = arith.mulf %35, %46 : vector<8x1xf32>
    %48 = vector.broadcast %44 : vector<8x1xf32> to vector<8x256xf32>
    %49 = arith.subf %38, %48 : vector<8x256xf32>
    %50 = math.exp %49 : vector<8x256xf32>
    %cst_27 = arith.constant dense<0.000000e+00> : vector<8xf32>
    %51 = vector.multi_reduction <add>, %50, %cst_27 [1] : vector<8x256xf32> to vector<8xf32>
    %52 = vector.shape_cast %51 : vector<8xf32> to vector<8x1xf32>
    %53 = arith.addf %47, %52 : vector<8x1xf32>
    %54 = vector.extract_strided_slice %10 {offsets = [0, 16], sizes = [8, 8], strides = [1, 1]} : vector<8x32xf32> to vector<8x8xf32>
    %55 = vector.extract_strided_slice %15 {offsets = [16, 0], sizes = [8, 256], strides = [1, 1]} : vector<32x256xf32> to vector<8x256xf32>
    %cst_28 = arith.constant dense<0.000000e+00> : vector<8x256xf32>
    %56 = tpu.matmul %54, %55, %cst_28 {dimension_numbers = #tpu.dot_dimension_numbers<[1], [0], [0], [1], [0, 0, 1, 1], [], []>} : vector<8x8xf32>, vector<8x256xf32>, vector<8x256xf32> -> vector<8x256xf32>
    %c0_29 = arith.constant 0 : index
    %c0_30 = arith.constant 0 : index
    %c512 = arith.constant 512 : index
    %57 = vector.load %arg8[%c0_29, %c0_30, %c512] : memref<1x8x1024xf32, #tpu.memory_space<vmem>>, vector<1x8x256xf32>
    %58 = vector.shape_cast %57 : vector<1x8x256xf32> to vector<8x256xf32>
    %59 = vector.shape_cast %56 : vector<8x256xf32> to vector<1x8x256xf32>
    tpu.vector_store %arg8[%c0_29, %c0_30, %c512], %59 {strides = array<i32>} : memref<1x8x1024xf32, #tpu.memory_space<vmem>>, vector<1x8x256xf32>,
    %cst_31 = arith.constant dense<0xFF800000> : vector<8xf32>
    %60 = vector.multi_reduction <maximumf>, %56, %cst_31 [1] : vector<8x256xf32> to vector<8xf32>
    %61 = vector.shape_cast %60 : vector<8xf32> to vector<8x1xf32>
    %62 = arith.maximumf %44, %61 : vector<8x1xf32>
    %63 = arith.subf %44, %62 : vector<8x1xf32>
    %64 = math.exp %63 : vector<8x1xf32>
    %65 = arith.mulf %53, %64 : vector<8x1xf32>
    %66 = vector.broadcast %62 : vector<8x1xf32> to vector<8x256xf32>
    %67 = arith.subf %56, %66 : vector<8x256xf32>
    %68 = math.exp %67 : vector<8x256xf32>
    %cst_32 = arith.constant dense<0.000000e+00> : vector<8xf32>
    %69 = vector.multi_reduction <add>, %68, %cst_32 [1] : vector<8x256xf32> to vector<8xf32>
    %70 = vector.shape_cast %69 : vector<8xf32> to vector<8x1xf32>
    %71 = arith.addf %65, %70 : vector<8x1xf32>
    %72 = vector.extract_strided_slice %10 {offsets = [0, 24], sizes = [8, 8], strides = [1, 1]} : vector<8x32xf32> to vector<8x8xf32>
    %73 = vector.extract_strided_slice %15 {offsets = [24, 0], sizes = [8, 256], strides = [1, 1]} : vector<32x256xf32> to vector<8x256xf32>
    %cst_33 = arith.constant dense<0.000000e+00> : vector<8x256xf32>
    %74 = tpu.matmul %72, %73, %cst_33 {dimension_numbers = #tpu.dot_dimension_numbers<[1], [0], [0], [1], [0, 0, 1, 1], [], []>} : vector<8x8xf32>, vector<8x256xf32>, vector<8x256xf32> -> vector<8x256xf32>
    %c0_34 = arith.constant 0 : index
    %c0_35 = arith.constant 0 : index
    %c768 = arith.constant 768 : index
    %75 = vector.load %arg8[%c0_34, %c0_35, %c768] : memref<1x8x1024xf32, #tpu.memory_space<vmem>>, vector<1x8x256xf32>
    %76 = vector.shape_cast %75 : vector<1x8x256xf32> to vector<8x256xf32>
    %77 = vector.shape_cast %74 : vector<8x256xf32> to vector<1x8x256xf32>
    tpu.vector_store %arg8[%c0_34, %c0_35, %c768], %77 {strides = array<i32>} : memref<1x8x1024xf32, #tpu.memory_space<vmem>>, vector<1x8x256xf32>,
    %cst_36 = arith.constant dense<0xFF800000> : vector<8xf32>
    %78 = vector.multi_reduction <maximumf>, %74, %cst_36 [1] : vector<8x256xf32> to vector<8xf32>
    %79 = vector.shape_cast %78 : vector<8xf32> to vector<8x1xf32>
    %80 = arith.maximumf %62, %79 : vector<8x1xf32>
    %81 = arith.subf %62, %80 : vector<8x1xf32>
    %82 = math.exp %81 : vector<8x1xf32>
    %83 = arith.mulf %71, %82 : vector<8x1xf32>
    %84 = vector.broadcast %80 : vector<8x1xf32> to vector<8x256xf32>
    %85 = arith.subf %74, %84 : vector<8x256xf32>
    %86 = math.exp %85 : vector<8x256xf32>
    %cst_37 = arith.constant dense<0.000000e+00> : vector<8xf32>
    %87 = vector.multi_reduction <add>, %86, %cst_37 [1] : vector<8x256xf32> to vector<8xf32>
    %88 = vector.shape_cast %87 : vector<8xf32> to vector<8x1xf32>
    %89 = arith.addf %83, %88 : vector<8x1xf32>
    %90 = tpu.reciprocal %89 {approx = true} : vector<8x1xf32> -> vector<8x1xf32>
    %c0_38 = arith.constant 0 : index
    %c0_39 = arith.constant 0 : index
    %c0_40 = arith.constant 0 : index
    %91 = vector.load %arg8[%c0_38, %c0_39, %c0_40] : memref<1x8x1024xf32, #tpu.memory_space<vmem>>, vector<1x8x256xf32>
    %92 = vector.shape_cast %91 : vector<1x8x256xf32> to vector<8x256xf32>
    %93 = vector.broadcast %80 : vector<8x1xf32> to vector<8x256xf32>
    %94 = arith.subf %92, %93 : vector<8x256xf32>
    %95 = math.exp %94 : vector<8x256xf32>
    %96 = vector.broadcast %90 : vector<8x1xf32> to vector<8x256xf32>
    %97 = arith.mulf %95, %96 : vector<8x256xf32>
    %c0_41 = arith.constant 0 : index
    %c0_42 = arith.constant 0 : index
    %c0_43 = arith.constant 0 : index
    %98 = vector.load %arg8[%c0_41, %c0_42, %c0_43] : memref<1x8x1024xf32, #tpu.memory_space<vmem>>, vector<1x8x256xf32>
    %99 = vector.shape_cast %98 : vector<1x8x256xf32> to vector<8x256xf32>
    %100 = vector.shape_cast %97 : vector<8x256xf32> to vector<1x8x256xf32>
    tpu.vector_store %arg8[%c0_41, %c0_42, %c0_43], %100 {strides = array<i32>} : memref<1x8x1024xf32, #tpu.memory_space<vmem>>, vector<1x8x256xf32>,
    %c0_44 = arith.constant 0 : index
    %c0_45 = arith.constant 0 : index
    %c256_46 = arith.constant 256 : index
    %101 = vector.load %arg8[%c0_44, %c0_45, %c256_46] : memref<1x8x1024xf32, #tpu.memory_space<vmem>>, vector<1x8x256xf32>
    %102 = vector.shape_cast %101 : vector<1x8x256xf32> to vector<8x256xf32>
    %103 = vector.broadcast %80 : vector<8x1xf32> to vector<8x256xf32>
    %104 = arith.subf %102, %103 : vector<8x256xf32>
    %105 = math.exp %104 : vector<8x256xf32>
    %106 = vector.broadcast %90 : vector<8x1xf32> to vector<8x256xf32>
    %107 = arith.mulf %105, %106 : vector<8x256xf32>
    %c0_47 = arith.constant 0 : index
    %c0_48 = arith.constant 0 : index
    %c256_49 = arith.constant 256 : index
    %108 = vector.load %arg8[%c0_47, %c0_48, %c256_49] : memref<1x8x1024xf32, #tpu.memory_space<vmem>>, vector<1x8x256xf32>
    %109 = vector.shape_cast %108 : vector<1x8x256xf32> to vector<8x256xf32>
    %110 = vector.shape_cast %107 : vector<8x256xf32> to vector<1x8x256xf32>
    tpu.vector_store %arg8[%c0_47, %c0_48, %c256_49], %110 {strides = array<i32>} : memref<1x8x1024xf32, #tpu.memory_space<vmem>>, vector<1x8x256xf32>,
    %c0_50 = arith.constant 0 : index
    %c0_51 = arith.constant 0 : index
    %c512_52 = arith.constant 512 : index
    %111 = vector.load %arg8[%c0_50, %c0_51, %c512_52] : memref<1x8x1024xf32, #tpu.memory_space<vmem>>, vector<1x8x256xf32>
    %112 = vector.shape_cast %111 : vector<1x8x256xf32> to vector<8x256xf32>
    %113 = vector.broadcast %80 : vector<8x1xf32> to vector<8x256xf32>
    %114 = arith.subf %112, %113 : vector<8x256xf32>
    %115 = math.exp %114 : vector<8x256xf32>
    %116 = vector.broadcast %90 : vector<8x1xf32> to vector<8x256xf32>
    %117 = arith.mulf %115, %116 : vector<8x256xf32>
    %c0_53 = arith.constant 0 : index
    %c0_54 = arith.constant 0 : index
    %c512_55 = arith.constant 512 : index
    %118 = vector.load %arg8[%c0_53, %c0_54, %c512_55] : memref<1x8x1024xf32, #tpu.memory_space<vmem>>, vector<1x8x256xf32>
    %119 = vector.shape_cast %118 : vector<1x8x256xf32> to vector<8x256xf32>
    %120 = vector.shape_cast %117 : vector<8x256xf32> to vector<1x8x256xf32>
    tpu.vector_store %arg8[%c0_53, %c0_54, %c512_55], %120 {strides = array<i32>} : memref<1x8x1024xf32, #tpu.memory_space<vmem>>, vector<1x8x256xf32>,
    %c0_56 = arith.constant 0 : index
    %c0_57 = arith.constant 0 : index
    %c768_58 = arith.constant 768 : index
    %121 = vector.load %arg8[%c0_56, %c0_57, %c768_58] : memref<1x8x1024xf32, #tpu.memory_space<vmem>>, vector<1x8x256xf32>
    %122 = vector.shape_cast %121 : vector<1x8x256xf32> to vector<8x256xf32>
    %123 = vector.broadcast %80 : vector<8x1xf32> to vector<8x256xf32>
    %124 = arith.subf %122, %123 : vector<8x256xf32>
    %125 = math.exp %124 : vector<8x256xf32>
    %126 = vector.broadcast %90 : vector<8x1xf32> to vector<8x256xf32>
    %127 = arith.mulf %125, %126 : vector<8x256xf32>
    %c0_59 = arith.constant 0 : index
    %c0_60 = arith.constant 0 : index
    %c768_61 = arith.constant 768 : index
    %128 = vector.load %arg8[%c0_59, %c0_60, %c768_61] : memref<1x8x1024xf32, #tpu.memory_space<vmem>>, vector<1x8x256xf32>
    %129 = vector.shape_cast %128 : vector<1x8x256xf32> to vector<8x256xf32>
    %130 = vector.shape_cast %127 : vector<8x256xf32> to vector<1x8x256xf32>
    tpu.vector_store %arg8[%c0_59, %c0_60, %c768_61], %130 {strides = array<i32>} : memref<1x8x1024xf32, #tpu.memory_space<vmem>>, vector<1x8x256xf32>,
    return
  }
  func.func @transform_0(%arg0: i32, %arg1: i32) -> (i32, i32, i32) {
    %c0_i32 = arith.constant 0 : i32
    %c0_i32_0 = arith.constant 0 : i32
    return %arg0, %arg1, %c0_i32 : i32, i32, i32
  }
  func.func @transform_1(%arg0: i32, %arg1: i32) -> (i32, i32, i32) {
    %c0_i32 = arith.constant 0 : i32
    %c0_i32_0 = arith.constant 0 : i32
    %c0_i32_1 = arith.constant 0 : i32
    return %arg0, %c0_i32, %c0_i32_0 : i32, i32, i32
  }
  func.func @transform_2(%arg0: i32, %arg1: i32) -> (i32, i32) {
    %c0_i32 = arith.constant 0 : i32
    %c0_i32_0 = arith.constant 0 : i32
    %c0_i32_1 = arith.constant 0 : i32
    return %c0_i32, %c0_i32_0 : i32, i32
  }
  func.func @transform_3(%arg0: i32, %arg1: i32) -> (i32, i32) {
    %c0_i32 = arith.constant 0 : i32
    %c0_i32_0 = arith.constant 0 : i32
    %c0_i32_1 = arith.constant 0 : i32
    return %c0_i32, %c0_i32_0 : i32, i32
  }
  func.func @transform_4(%arg0: i32, %arg1: i32) -> (i32, i32) {
    %c0_i32 = arith.constant 0 : i32
    %c0_i32_0 = arith.constant 0 : i32
    %c0_i32_1 = arith.constant 0 : i32
    return %c0_i32, %c0_i32_0 : i32, i32
  }
  func.func @transform_5(%arg0: i32, %arg1: i32) -> (i32, i32) {
    %c0_i32 = arith.constant 0 : i32
    %c0_i32_0 = arith.constant 0 : i32
    %c0_i32_1 = arith.constant 0 : i32
    return %c0_i32, %c0_i32_0 : i32, i32
  }
  func.func @transform_6(%arg0: i32, %arg1: i32) -> (i32, i32, i32) {
    %c0_i32 = arith.constant 0 : i32
    %c0_i32_0 = arith.constant 0 : i32
    return %arg0, %arg1, %c0_i32 : i32, i32, i32
  }
}

</mosaic_0001>

<bundles_post_ra>
// kernel: tpu_custom_call.1
= control target key start
LH: loop header
LB: loop body
LE: loop exit
PB: predicated region body
PF: predicated region fallthrough
CT: control target
= control target key end

     0   :  { %s1812_s0 = inlined_call_operand.hbm [shape: f32[2,8,32], index: 0, kind: input, shape index: {}]   ;;  %s1813_s1 = inlined_call_operand.hbm [shape: f32[2,32,256], index: 1, kind: input, shape index: {}]   ;;  %s1814_s2 = inlined_call_operand.vmem [shape: f32[32,32], index: 2, kind: input, shape index: {}]   ;;  %s1815_s3 = inlined_call_operand.vmem [shape: f32[1,32], index: 3, kind: input, shape index: {}]   ;;  %s1816_s4 = inlined_call_operand.hbm [shape: f32[32,32], index: 4, kind: input, shape index: {}]   ;;  %s1817_s5 = inlined_call_operand.vmem [shape: f32[32,1], index: 5, kind: input, shape index: {}]   ;;  %s1818_s6 = inlined_call_operand.hbm [shape: f32[2,8,1024], index: 6, kind: output, shape index: {}]  }
   0x1   :  { %1822 = sst [smem:[#allocation17_spill]] %s1812_s0 }
   0x2   :  { %1823 = sst [smem:[#allocation18_spill]] %s1816_s4 }
   0x3   :  { %11 = vsyncpa [#allocation3], 0 }
   0x4   :  { %13 = vsyncpa [#allocation3 + $0x1], 0 }
   0x5   :  { %14 = vsyncpa [#allocation6], 0 }
   0x6   :  { %16 = vsyncpa [#allocation6 + $0x1], 0 }
   0x7   :  { %17 = vsyncpa [#allocation4], 0 }
   0x8   :  { %19 = vsyncpa [#allocation4 + $0x1], 0  ;;  %s1522_s21 = smov 0   ;;  %s1524_s22 = smov 0  }
   0x9   :  { %s1526_s23 = smov 0   ;;  %s1528_s24 = smov 0  }
   0xa   :  { %s1530_s25 = smov 0   ;;  %s1532_s26 = smov 0  }
   0xb LB: > { %1824 = sst [smem:[#allocation13_spill]] %s1467_s25  ;;  %s1553_s27 = sadd.s32 4294967295, %s1471_s26   ;;  %s1471_s26 = sphi %s1532_s26, %s25_s26   ;;  %s1467_s25 = sphi %s1530_s25, %s1842_s25   ;;  %s1463_s24 = sphi %s1528_s24, %s1841_s24   ;;  %s1459_s23 = sphi %s1526_s23, %s1845_s23   ;;  %s1455_s22 = sphi %s1524_s22, %s1844_s22   ;;  %s1451_s21 = sphi %s1522_s21, %s1843_s21  }
   0xc   : > { %s1122_s28 = sadd.s32 4294967294, %s1471_s26   ;;  %p59_p0 = scmp.ne.s32.totalorder %s1455_s22, %s1451_s21 }
   0xd   : > { %p60_p1 = scmp.eq.s32.totalorder %s1553_s27, 0  ;;  %p201_p3 = scmp.eq.s32.totalorder %s1122_s28, 1 }
   0xe   : > { %p1123_p5 = scmp.ge.s32.totalorder %s1471_s26, 1  ;;  %p208_p7 = scmp.lt.s32.totalorder %s1471_s26, 3 }
   0xf   : > { %p1562_p4 = por %p60_p1, %p59_p0  ;;  %p1567_p6 = por %p201_p3, %p59_p0 }
  0x10   : > { %p1572_p8 = pnand %p1123_p5, %p208_p7  ;;  %s1473_s8 = smov [#allocation7]  }
  0x11   : > { %s1826_s30 = scalar_select %p1567_p6, 1, 0 }
  0x12   : > { %s226_s9 = sshll.u32 %s1473_s8, 4  ;;  %p1179_p9 = pneg %p1572_p8  ;;  %s227_s9 = int_to_ptr.vmem [resolvable:$true] %s226_s9 }
  0x13   : > { %1827 = sst [smem:[#allocation14_spill]] %s1826_s30  ;;  %p1125_p10 = scmp.ge.s32.totalorder %s1471_s26, 2 }
  0x14   : > { %p1581_p11 = pnand %p1179_p9, %p60_p1  ;;  %s37_s11 = sadd.s32 1, %s1467_s25 }
  0x15   : > { %s1312_s12 = scalar_lea.vmem %s227_s9, 512  ;;  %p1320_p5 = scmp.lt.s32.totalorder %s227_s9, %s227_s9 }
  0x16   : > { %p1303_p12 = pneg %p1581_p11  ;;  %p1313_p13 = scmp.ne.s32.totalorder %s227_s9, %s1312_s12 }
  0x17   : > { %p1321_p7 = scmp.lt.s32.totalorder %s1312_s12, %s1312_s12 }
  0x18   : > { %p1315_p0 = pnand %p1313_p13, %p1303_p12 }
  0x19   : > { %p1322_p2 = por %p1321_p7, %p1320_p5 }
  0x1a   : > { %p1316_p3 = pneg %p1315_p0 }
  0x1c   : > { %p1323_p6 = pnand %p1322_p2, %p1316_p3 }
  0x1e   : > { %1326 = shalt.err (!%p1323_p6)
}
  0x1f   : > { %s1474_s13 = smov 128   ;;  %s1475_s14 = smov 8  }
  0x20   : > { %s1830_s4 = sld [smem:[#allocation18_spill]]  ;;  %p39_p2 = scmp.ge.s32.totalorder %s37_s11, 2 }
  0x21   : > { %s46_s17 = sadd.s32 1, %s1459_s23  ;;  %p53_p6 = scmp.ne.s32.totalorder %s1459_s23, %s1455_s22 }
  0x22   : > { %p54_p9 = scmp.eq.s32.totalorder %s1471_s26, 0  ;;  %s1847_s11 = smov (%p39_p2, %s37_s11), 0 }
  0x23   : > { %1831 = sst [smem:[#allocation15_spill]] %s1847_s11  ;;  %p1833_p13 = scmp.eq.s32.totalorder %s1553_s27, 1 }
  0x24   : > { %p1599_p12 = por %p54_p9, %p53_p6  ;;  %s41_s20 = ssub.s32 %s1467_s25, %s1847_s11 }
  0x25   : > { %p1605_p0 = por %p1833_p13, %p53_p6  ;;  %p44_p3 = scmp.eq.s32.totalorder %s41_s20, 0 }
  0x26   : > { %1182 = dma.hbm_to_vmem [thread:$0]  (!%p1581_p11), %s1830_s4, 512, %s227_s9, [#allocation6], %s1474_s13, %s1474_s13, %s1475_s14  }
  0x27   : > { %p1195_p11 = scmp.lt.s32.totalorder %s1471_s26, 2  ;;  %s243_s28 = sand.u32 1, %s1459_s23  }
  0x28   : > { %s1126_s8 = sshll.u32 %s243_s28, 3  ;;  %s1127_s10 = sshll.u32 %s1467_s25, 7 }
  0x29   : > { %s1614_s9 = scalar_select %p44_p3, %s1459_s23, %s46_s17  }
  0x2a   : > { %s1836_s0 = sld [smem:[#allocation17_spill]]  ;;  %s247_s15 = scalar_lea.vmem [#allocation2], %s1126_s8 }
  0x2b   : > { %1835 = sst [smem:[#allocation16_spill]] %s1614_s9  ;;  %s255_s16 = sshll.u32 %s247_s15, 4  ;;  %s256_s16 = int_to_ptr.vmem [resolvable:$true] %s255_s16 }
  0x2c   : > { %p1622_p5 = pnand %p1195_p11, %p1599_p12  ;;  %s1128_s20 = sshll.u32 %s243_s28, 6 }
  0x2d   : > { %s1151_s11 = sshll.u32 %s1467_s25, 10  ;;  %s244_s30 = scalar_lea.sflag [#allocation3], %s243_s28 }
  0x2e   : > { %p1329_p7 = pneg %p1622_p5  ;;  %s1340_s17 = scalar_lea.vmem %s256_s16, 128 }
  0x2f   : > { %p1341_p2 = scmp.ne.s32.totalorder %s256_s16, %s1340_s17  ;;  %s1476_s8 = smov [#allocation2]  }
  0x30   : > { %s253_s14 = scalar_lea.hbm %s1836_s0, %s1127_s10  ;;  %s1345_s10 = sshll.u32 %s1476_s8, 4  ;;  %s1346_s10 = int_to_ptr.vmem [resolvable:$false] %s1345_s10 }
  0x31   : > { %p1343_p6 = pnand %p1341_p2, %p1329_p7  ;;  %s1347_s18 = scalar_lea.vmem %s1346_s10, 256 }
  0x32   : > { %p1348_p12 = scmp.lt.s32.totalorder %s256_s16, %s1346_s10  ;;  %p1349_p13 = scmp.lt.s32.totalorder %s1347_s18, %s1340_s17 }
  0x33   : > { %p1344_p9 = pneg %p1343_p6 }
  0x34   : > { %p1350_p11 = por %p1349_p13, %p1348_p12 }
  0x36   : > { %p1351_p3 = pnand %p1350_p11, %p1344_p9 }
  0x38   : > { %1354 = shalt.err (!%p1351_p3)
}
  0x39   : > { %1186 = dma.hbm_to_vmem [thread:$0]  (!%p1622_p5), %s253_s14, 128, %s256_s16, %s244_s30  }
  0x3a   : > { %s266_s28 = scalar_lea.vmem [#allocation5], %s1128_s20  ;;  %s262_s13 = sand.u32 1, %s1471_s26  }
  0x3b   : > { %s273_s12 = sshll.u32 %s266_s28, 4  ;;  %s272_s8 = scalar_lea.hbm %s1813_s1, %s1151_s11  ;;  %s274_s12 = int_to_ptr.vmem [resolvable:$true] %s273_s12 }
  0x3c   : > { %s263_s25 = scalar_lea.sflag [#allocation6], %s262_s13  ;;  %s1368_s9 = scalar_lea.vmem %s274_s12, 1024 }
  0x3d   : > { %p1369_p2 = scmp.ne.s32.totalorder %s274_s12, %s1368_s9  ;;  %s1477_s17 = smov [#allocation5]  }
  0x3e   : > { %s1373_s10 = sshll.u32 %s1477_s17, 4  ;;  %s1374_s10 = int_to_ptr.vmem [resolvable:$false] %s1373_s10 }
  0x3f   : > { %p1371_p6 = pnand %p1369_p2, %p1329_p7  ;;  %s1375_s18 = scalar_lea.vmem %s1374_s10, 2048 }
  0x40   : > { %p1376_p12 = scmp.lt.s32.totalorder %s274_s12, %s1374_s10  ;;  %p1377_p13 = scmp.lt.s32.totalorder %s1375_s18, %s1368_s9 }
  0x41   : > { %p1372_p9 = pneg %p1371_p6 }
  0x42   : > { %p1378_p11 = por %p1377_p13, %p1376_p12 }
  0x44   : > { %p1379_p3 = pnand %p1378_p11, %p1372_p9 }
  0x46   : > { %1382 = shalt.err (!%p1379_p3)
}
  0x47   : > { %s1478_s30 = smov 256   ;;  %s1479_s0 = smov 16  }
  0x48   : > { %1189 = dma.hbm_to_vmem [thread:$0]  (!%p1622_p5), %s272_s8, 1024, %s274_s12, %s263_s25, %s1478_s30, %s1478_s30, %s1479_s0  }
  0x49   : > { %285 = sbr.rel (%p1572_p8) target bundleno = 944 (0x3b0), region = 44  ;;  %s1646_s11 = sand.u32 (!%p1572_p8), 1, %s1455_s22  }
  0x4a   : > { %s1132_s14 = sshll.u32 (!%p1572_p8), %s1646_s11, 3  ;;  %s288_s16 = scalar_lea.sflag (!%p1572_p8), [#allocation3], %s1646_s11 }
  0x4b   : > { %s1650_s9 = scalar_lea.vmem (!%p1572_p8), [#allocation2], %s1132_s14 }
  0x4e   : > { %1434 = dma.done.wait (%p1562_p4), %s288_s16, 128  }
  0x4f   : > { %1436 = vsyncadd (%p1562_p4), %s288_s16, 4294967168  ;;  %s296_s4 = sand.u32 1, %s1553_s27   ;;  %s1133_s25 = sshll.u32 %s1646_s11, 6 }
  0x50   : > { %s297_s7 = scalar_lea.sflag [#allocation6], %s296_s4  ;;  %s1660_s20 = scalar_lea.vmem [#allocation5], %s1133_s25 }
  0x51   : > { %1438 = dma.done.wait (%p1562_p4), %s297_s7, 1024  }
  0x52   : > { %1440 = vsyncadd (%p1562_p4), %s297_s7, 4294966272 }
  0x53   : > { %1442 = dma.done.wait (%p60_p1), [#allocation6], 512  }
  0x54   : > { %1444 = vsyncadd (%p60_p1), [#allocation6], 4294966784  ;;  %v1480_v0 = vmov 0.0   ;;  %vm1481_vm0 = vmmov 0   ;;  %v1482_v1 = vmov 0   ;;  %v350_v2 = vld [vmem:[%s1814_s2 + $0x18] sm:$0xff] }
  0x55   : > { %1158 = vmatprep.subr.mxu0 %v1480_v0  ;;  %1166 = vmatprep.mubr.msk.f32.mxu0 %vm1481_vm0, %v1480_v0  ;;  %v346_v3 = vld [vmem:[%s1660_s20 + $0x38] sm:$0xff]  ;;  %v345_v4 = vld [vmem:[%s1660_s20 + $0x30] sm:$0xff]  ;;  %v349_v5 = vld [vmem:[%s1814_s2 + $0x10] sm:$0xff]  ;;  %vm358_vm1 = vcmask 261120   ;;  %s1483_s29 = smov 112   ;;  %s1484_s27 = smov 120  }
  0x56   : > { %537 = vmatprep.mubr.f32.mxu1 %v1480_v0  ;;  %1257 = vset.pattern.permute.xlu0 %v1482_v1  ;;  %v344_v6 = vld [vmem:[%s1660_s20 + $0x28] sm:$0xff]  ;;  %v343_v7 = vld [vmem:[%s1660_s20 + $0x20] sm:$0xff]  ;;  %v348_v8 = vld [vmem:[%s1814_s2 + $0x8] sm:$0xff]  ;;  %vm562_vm2 = vcmask 64512   ;;  %s1485_s28 = smov 104   ;;  %s1152_s12 = sshll.u32 %s1463_s24, 10 }
  0x57   : > { %1258 = vset.pattern.permute.xlu1 %v1482_v1  ;;  %1159 = vmatpush3.msra.mxu0 %v350_v2  ;;  %v342_v9 = vld [vmem:[%s1660_s20 + $0x18] sm:$0xff]  ;;  %v341_v10 = vld [vmem:[%s1660_s20 + $0x10] sm:$0xff]  ;;  %v340_v12 = vld [vmem:[%s1660_s20 + $0x8] sm:$0xff]  ;;  %s337_s13 = scalar_lea.vmem [#allocation8], %s1133_s25  ;;  %s1764_s10 = scalar_lea.hbm %s1818_s6, %s1152_s12 }
  0x58   : > { %497 = vmatprep.subr.mxu1 %v346_v3  ;;  %1160 = vmatprep.subr.mxu0 %v1480_v0  ;;  %v347_v11 = vld [vmem:[%s1814_s2] sm:$0xff]  ;;  %v339_v14 = vld [vmem:[%s1660_s20] sm:$0xff]  ;;  %v434_v18 = vld [vmem:[#allocation7 + $0x8] sm:$0xff]  ;;  %s1007_s15 = sshll.u32 %s337_s13, 4  ;;  %s991_s24 = scalar_lea.sflag [#allocation4], %s1646_s11  ;;  %s1766_s15 = int_to_ptr.vmem [resolvable:$true] %s1007_s15 }
  0x59   : > { %498 = vmatpush1.msra.mxu1 %v345_v4  ;;  %1161 = vmatpush3.msra.mxu0 %v349_v5  ;;  %v338_v13 = vld [vmem:[%s1650_s9] sm:$0xff]  ;;  %v433_v15 = vld [vmem:[#allocation7] sm:$0xff]  ;;  %v440_v20 = vld [vmem:[%s1817_s5 + $0x18] sm:$0xff]  ;;  %s1383_s25 = scalar_lea.vmem %s1766_s15, 1024  ;;  %s1486_s18 = smov [#allocation8]  }
  0x5a   : > { %499 = vmatprep.subr.mxu1 %v344_v6  ;;  %1162 = vmatprep.subr.mxu0 %v1480_v0  ;;  %v437_v16 = vld [vmem:[%s1817_s5] sm:$0xff]  ;;  %v439_v17 = vld [vmem:[%s1817_s5 + $0x10] sm:$0xff]  ;;  %v438_v19 = vld [vmem:[%s1817_s5 + $0x8] sm:$0xff]  ;;  %p1384_p1 = scmp.ne.s32.totalorder %s1766_s15, %s1383_s25  ;;  %s1387_s30 = sshll.u32 %s1486_s18, 4  ;;  %s1388_s30 = int_to_ptr.vmem [resolvable:$false] %s1387_s30 }
  0x5b   : > { %500 = vmatpush1.msra.mxu1 %v343_v7  ;;  %1163 = vmatpush3.msra.mxu0 %v348_v8  ;;  %v435_v21 = vld [vmem:[#allocation7 + $0x10] sm:$0xff]  ;;  %v436_v22 = vld [vmem:[#allocation7 + $0x18] sm:$0xff]  ;;  %s1389_s0 = scalar_lea.vmem %s1388_s30, 2048  ;;  %p1390_p5 = scmp.lt.s32.totalorder %s1766_s15, %s1388_s30 }
  0x5c   : > { %501 = vmatprep.subr.mxu1 %v342_v9  ;;  %1164 = vmatprep.subr.mxu0 %v1480_v0  ;;  %v1136_v23 = vld [vmem:[%s1815_s3] ss:$0 sm:$0xff]  ;;  %p1385_p4 = pnand %p1384_p1, %p1605_p0  ;;  %p1391_p7 = scmp.lt.s32.totalorder %s1389_s0, %s1383_s25 }
  0x5d   : > { %502 = vmatpush1.msra.mxu1 %v341_v10  ;;  %1165 = vmatpush3.msra.mxu0 %v347_v11 }
  0x5e   : > { %503 = vmatprep.subr.mxu1 %v340_v12  ;;  %1167 = vmatmul.mubr.msk.f32.vlgmr.msra.gmra.mxu0 %vm358_vm1, %v338_v13  ;;  %p1386_p8 = pneg %p1385_p4  ;;  %p1392_p2 = por %p1391_p7, %p1390_p5 }
  0x5f   : > { %504 = vmatpush1.msra.mxu1 %v339_v14  ;;  %443 = vperm.xlu0 %1257, %v437_v16  }
  0x60   : > { %1138 = vmatmul.mubr.msk.f32.vlgmr.msra.gmra.mxu1 %vm358_vm1, %v433_v15  ;;  %453 = vperm.xlu1 %1258, %v439_v17   ;;  %p1393_p6 = pnand %p1392_p2, %p1386_p8 }
  0x61   : > { %543 = vmatprep.mubr.f32.mxu1 %v1480_v0  ;;  %630 = vmatprep.mubr.f32.mxu0 %v1480_v0 }
  0x63   : > { %448 = vperm.xlu0 %1257, %v438_v19  }
  0x64   : > { %1139 = vmatmul.mubr.msk.f32.gmra.mxu1 %vm358_vm1, %v434_v18  ;;  %458 = vperm.xlu1 %1258, %v440_v20  }
  0x65   : > { %549 = vmatprep.mubr.f32.mxu1 %v1480_v0 }
  0x68   : > { %1140 = vmatmul.mubr.msk.f32.gmra.mxu1 %vm358_vm1, %v435_v21 }
  0x69   : > { %555 = vmatprep.mubr.f32.mxu1 %v1480_v0 }
  0x6c   : > { %1141 = vmatmul.mubr.msk.f32.gmra.mxu1 %vm358_vm1, %v436_v22 }
  0xda   : > { %v444_v25 = vpop.permute.xlu0 %443 }
  0xdb   : > { %v454_v39 = vpop.permute.xlu1 %453 }
  0xde   : > { %v449_v33 = vpop.permute.xlu0 %448 }
  0xdf   : > { %v459_v43 = vpop.permute.xlu1 %458 }
 0x11e   : > { %v428_v24 = vpop.f32.mrf.mxu0 }
 0x11f   : > { %v429_v26 = vadd.f32 %v1136_v23, %v428_v24 }
 0x120   : > { %v539_v27 = vpop.f32.mrf.mxu1  ;;  %v1168_v28 = vpop.f32.mrf.mxu0 }
 0x121   : > { %v432_v29 = vmul.f32 0.35355338, %v429_v26  ;;  %v540_v30 = vadd.f32 %v539_v27, %v444_v25 }
 0x122   : > { %v541_v31 = vpop.f32.mrf.mxu1 }
 0x123   : > { %v542_v32 = vadd.f32 %v541_v31, %v444_v25  ;;  %751 = vrot.lane.b32.xlu1 %v432_v29, %s1483_s29  ;;  %656 = vrot.lane.b32.xlu0 %v432_v29, %s1484_s27 }
 0x124   : > { %v545_v34 = vpop.f32.mrf.mxu1 }
 0x125   : > { %596 = vmatprep.subr.mxu0 %v542_v32  ;;  %v546_v35 = vadd.f32 %v545_v34, %v449_v33 }
 0x126   : > { %597 = vmatpush1.msra.mxu0 %v540_v30  ;;  %v547_v36 = vpop.f32.mrf.mxu1 }
 0x127   : > { %1142 = vmatmul.mubr.msk.f32.vlgmr.msra.gmra.mxu0 %vm562_vm2, %v432_v29  ;;  %v548_v37 = vadd.f32 %v547_v36, %v449_v33  ;;  %846 = vrot.lane.b32.xlu0 %v432_v29, %s1485_s28 }
 0x128   : > { %v551_v38 = vpop.f32.mrf.mxu1  ;;  %724 = vmatprep.mubr.f32.mxu0 %v1480_v0 }
 0x129   : > { %690 = vmatprep.subr.mxu0 %v548_v37  ;;  %v552_v45 = vadd.f32 %v551_v38, %v454_v39 }
 0x12a   : > { %v553_v40 = vpop.f32.mrf.mxu1  ;;  %691 = vmatpush1.msra.mxu0 %v546_v35 }
 0x12b   : > { %v554_v41 = vadd.f32 %v553_v40, %v454_v39 }
 0x12c   : > { %v557_v42 = vpop.f32.mrf.mxu1 }
 0x12d   : > { %785 = vmatprep.subr.mxu0 %v554_v41  ;;  %v558_v48 = vadd.f32 %v557_v42, %v459_v43 }
 0x12e   : > { %v559_v44 = vpop.f32.mrf.mxu1 }
 0x12f   : > { %v560_v47 = vadd.f32 %v559_v44, %v459_v43 }
 0x195   : > { %v657_v46 = vpop.permute.xlu0 %656  ;;  %v752_v49 = vpop.permute.xlu1 %751 }
 0x196   : > { %1143 = vmatmul.mubr.msk.f32.vlgmr.msra.gmra.mxu0 %vm562_vm2, %v657_v46 }
 0x197   : > { %786 = vmatpush1.msra.mxu0 %v552_v45  ;;  %819 = vmatprep.mubr.f32.mxu0 %v1480_v0 }
 0x198   : > { %880 = vmatprep.subr.mxu0 %v560_v47 }
 0x199   : > { %v847_v50 = vpop.permute.xlu0 %846 }
 0x19a   : > { %1144 = vmatmul.mubr.msk.f32.vlgmr.msra.gmra.mxu0 %vm562_vm2, %v752_v49 }
 0x19b   : > { %881 = vmatpush1.msra.mxu0 %v558_v48  ;;  %914 = vmatprep.mubr.f32.mxu0 %v1480_v0 }
 0x19e   : > { %1145 = vmatmul.mubr.msk.f32.vlgmr.msra.gmra.mxu0 %vm562_vm2, %v847_v50 }
 0x1e7   : > { %v1728_v51 = vpop.f32.mrf.mxu0 }
 0x1e9   : > { %v1730_v52 = vpop.f32.mrf.mxu0 }
 0x1ea   : > { %v639_v53 = vmax.f32 %v1728_v51, %v1730_v52 }
 0x1ec   : > { %640 = vmax.xlane.f32.xlu1 %v639_v53 }
 0x256   : > { %v1734_v54 = vpop.f32.mrf.mxu0 }
 0x258   : > { %v1736_v55 = vpop.f32.mrf.mxu0 }
 0x259   : > { %v733_v56 = vmax.f32 %v1734_v54, %v1736_v55 }
 0x25a   : > { %v1740_v57 = vpop.f32.mrf.mxu0 }
 0x25b   : > { %734 = vmax.xlane.f32.xlu0 %v733_v56 }
 0x25c   : > { %v1742_v58 = vpop.f32.mrf.mxu0 }
 0x25d   : > { %v828_v59 = vmax.f32 %v1740_v57, %v1742_v58 }
 0x25e   : > { %v916_v60 = vpop.f32.mrf.mxu0 }
 0x25f   : > { %829 = vmax.xlane.f32.xlu0 %v828_v59 }
 0x260   : > { %v918_v61 = vpop.f32.mrf.mxu0 }
 0x261   : > { %v923_v62 = vmax.f32 %v916_v60, %v918_v61 }
 0x263   : > { %924 = vmax.xlane.f32.xlu1 %v923_v62 }
 0x275   : > { %v641_v63 = vpop.xlane.xlu1 %640 }
 0x276   : > { %v646_v0 = vsub.f32 %v1728_v51, %v641_v63  ;;  %v647_v1 = vsub.f32 %v1730_v52, %v641_v63  ;;  %v642_v36 = vsub.f32 -inf, %v641_v63 }
 0x278   : > { %v648_v2 = vmul.f32 1.442695, %v646_v0  ;;  %v650_v3 = vmul.f32 1.442695, %v647_v1  ;;  %v643_v37 = vmul.f32 1.442695, %v642_v36 }
 0x27a   : > { %1259 = vpow2.f32 %v648_v2 }
 0x27b   : > { %1261 = vpow2.f32 %v650_v3 }
 0x287   : > { %v1260_v4 = vpop.eup %1259 }
 0x288   : > { %v1262_v5 = vpop.eup %1261 }
 0x289   : > { %v652_v6 = vadd.f32 %v1262_v5, %v1260_v4 }
 0x28b   : > { %653 = vadd.xlane.f32.xlu0 %v652_v6 }
 0x2e4   : > { %v735_v7 = vpop.xlane.xlu0 %734 }
 0x2e5   : > { %v736_v8 = vmax.f32 %v641_v63, %v735_v7 }
 0x2e7   : > { %v741_v9 = vsub.f32 %v1734_v54, %v736_v8  ;;  %v742_v10 = vsub.f32 %v1736_v55, %v736_v8  ;;  %v737_v38 = vsub.f32 %v641_v63, %v736_v8 }
 0x2e8   : > { %v830_v11 = vpop.xlane.xlu0 %829 }
 0x2e9   : > { %v743_v12 = vmul.f32 1.442695, %v741_v9  ;;  %v745_v13 = vmul.f32 1.442695, %v742_v10  ;;  %v831_v14 = vmax.f32 %v736_v8, %v830_v11  ;;  %v738_v39 = vmul.f32 1.442695, %v737_v38 }
 0x2eb   : > { %v832_v15 = vsub.f32 %v736_v8, %v831_v14  ;;  %v836_v16 = vsub.f32 %v1740_v57, %v831_v14  ;;  %v837_v17 = vsub.f32 %v1742_v58, %v831_v14  ;;  %1263 = vpow2.f32 %v743_v12 }
 0x2ec   : > { %v925_v18 = vpop.xlane.xlu1 %924  ;;  %1265 = vpow2.f32 %v745_v13 }
 0x2ed   : > { %v838_v19 = vmul.f32 1.442695, %v836_v16  ;;  %v840_v20 = vmul.f32 1.442695, %v837_v17  ;;  %v926_v21 = vmax.f32 %v831_v14, %v925_v18  ;;  %v833_v40 = vmul.f32 1.442695, %v832_v15 }
 0x2ef   : > { %1267 = vpow2.f32 %v838_v19  ;;  %v980_v22 = vsub.f32 %v916_v60, %v926_v21  ;;  %v981_v23 = vsub.f32 %v918_v61, %v926_v21  ;;  %v927_v25 = vsub.f32 %v831_v14, %v926_v21 }
 0x2f0   : > { %1269 = vpow2.f32 %v840_v20  ;;  %v944_v47 = vsub.f32 %v1728_v51, %v926_v21  ;;  %v945_v48 = vsub.f32 %v1730_v52, %v926_v21  ;;  %v956_v50 = vsub.f32 %v1734_v54, %v926_v21 }
 0x2f1   : > { %v982_v24 = vmul.f32 1.442695, %v980_v22  ;;  %v984_v26 = vmul.f32 1.442695, %v981_v23  ;;  %v928_v41 = vmul.f32 1.442695, %v927_v25  ;;  %v957_v56 = vsub.f32 %v1736_v55, %v926_v21 }
 0x2f2   : > { %v946_v61 = vmul.f32 1.442695, %v944_v47  ;;  %v968_v62 = vsub.f32 %v1740_v57, %v926_v21  ;;  %v948_v63 = vmul.f32 1.442695, %v945_v48  ;;  %v969_v0 = vsub.f32 %v1742_v58, %v926_v21 }
 0x2f3   : > { %1271 = vpow2.f32 %v982_v24  ;;  %v958_v2 = vmul.f32 1.442695, %v956_v50  ;;  %v960_v51 = vmul.f32 1.442695, %v957_v56 }
 0x2f4   : > { %1273 = vpow2.f32 %v984_v26  ;;  %v970_v5 = vmul.f32 1.442695, %v968_v62  ;;  %v972_v54 = vmul.f32 1.442695, %v969_v0 }
 0x2f5   : > { %1275 = vpow2.f32 %v643_v37 }
 0x2f6   : > { %1277 = vpow2.f32 %v738_v39 }
 0x2f7   : > { %1279 = vpow2.f32 %v833_v40 }
 0x2f8   : > { %v1264_v27 = vpop.eup %1263  ;;  %1281 = vpow2.f32 %v928_v41 }
 0x2f9   : > { %v1266_v28 = vpop.eup %1265  ;;  %1283 = vpow2.f32 %v946_v61 }
 0x2fa   : > { %v747_v29 = vadd.f32 %v1266_v28, %v1264_v27  ;;  %1285 = vpow2.f32 %v948_v63 }
 0x2fb   : > { %1287 = vpow2.f32 %v958_v2 }
 0x2fc   : > { %v1268_v30 = vpop.eup %1267  ;;  %748 = vadd.xlane.f32.xlu1 %v747_v29  ;;  %1289 = vpow2.f32 %v960_v51 }
 0x2fd   : > { %v1270_v31 = vpop.eup %1269  ;;  %1291 = vpow2.f32 %v970_v5 }
 0x2fe   : > { %v842_v32 = vadd.f32 %v1270_v31, %v1268_v30  ;;  %1293 = vpow2.f32 %v972_v54 }
 0x2ff   : > { %1295 = vpow2.f32 %v982_v24 }
 0x300   : > { %843 = vadd.xlane.f32.xlu0 %v842_v32  ;;  %v1272_v33 = vpop.eup %1271 }
 0x301   : > { %v1274_v34 = vpop.eup %1273 }
 0x302   : > { %v937_v35 = vadd.f32 %v1274_v34, %v1272_v33  ;;  %v1276_v42 = vpop.eup %1275 }
 0x303   : > { %v645_v44 = vmul.f32 0.0, %v1276_v42  ;;  %v1278_v46 = vpop.eup %1277 }
 0x304   : > { %938 = vadd.xlane.f32.xlu1 %v937_v35  ;;  %v1280_v60 = vpop.eup %1279 }
 0x305   : > { %v1282_v52 = vpop.eup %1281 }
 0x306   : > { %v1284_v58 = vpop.eup %1283 }
 0x307   : > { %v1286_v7 = vpop.eup %1285 }
 0x308   : > { %v1288_v8 = vpop.eup %1287 }
 0x309   : > { %v1290_v9 = vpop.eup %1289 }
 0x30a   : > { %v1292_v10 = vpop.eup %1291 }
 0x30b   : > { %v1294_v11 = vpop.eup %1293 }
 0x30c   : > { %v1296_v12 = vpop.eup %1295 }
 0x314   : > { %v654_v43 = vpop.xlane.xlu0 %653 }
 0x315   : > { %v655_v45 = vadd.f32 %v654_v43, %v645_v44 }
 0x317   : > { %v740_v49 = vmul.f32 %v1278_v46, %v655_v45 }
 0x385   : > { %v749_v53 = vpop.xlane.xlu1 %748 }
 0x386   : > { %v750_v59 = vadd.f32 %v749_v53, %v740_v49 }
 0x388   : > { %v835_v1 = vmul.f32 %v1280_v60, %v750_v59 }
 0x389   : > { %v844_v3 = vpop.xlane.xlu0 %843 }
 0x38a   : > { %v845_v4 = vadd.f32 %v844_v3, %v835_v1 }
 0x38c   : > { %v930_v6 = vmul.f32 %v1282_v52, %v845_v4 }
 0x38d   : > { %v939_v55 = vpop.xlane.xlu1 %938 }
 0x38e   : > { %v940_v57 = vadd.f32 %v939_v55, %v930_v6 }
 0x390   : > { %1297 = vrcp.f32 %v940_v57 }
 0x391   : > { %1299 = vpow2.f32 %v984_v26 }
 0x39d   : > { %v1298_v13 = vpop.eup %1297 }
 0x39e   : > { %v1300_v14 = vpop.eup %1299  ;;  %v950_v15 = vmul.f32 %v1298_v13, %v1284_v58  ;;  %v951_v16 = vmul.f32 %v1298_v13, %v1286_v7  ;;  %v962_v17 = vmul.f32 %v1298_v13, %v1288_v8  ;;  %v963_v18 = vmul.f32 %v1298_v13, %v1290_v9 }
 0x39f   : > { %v974_v19 = vmul.f32 %v1298_v13, %v1292_v10  ;;  %v975_v20 = vmul.f32 %v1298_v13, %v1294_v11  ;;  %v986_v21 = vmul.f32 %v1298_v13, %v1296_v12  ;;  %v987_v22 = vmul.f32 %v1300_v14, %v1298_v13 }
 0x3a0   : > { %952 = vst [vmem:[%s337_s13] sm:$0xff] %v950_v15  ;;  %953 = vst [vmem:[%s337_s13 + $0x8] sm:$0xff] %v951_v16 }
 0x3a1   : > { %964 = vst [vmem:[%s337_s13 + $0x10] sm:$0xff] %v962_v17  ;;  %965 = vst [vmem:[%s337_s13 + $0x18] sm:$0xff] %v963_v18 }
 0x3a2   : > { %976 = vst [vmem:[%s337_s13 + $0x20] sm:$0xff] %v974_v19  ;;  %977 = vst [vmem:[%s337_s13 + $0x28] sm:$0xff] %v975_v20 }
 0x3a3   : > { %988 = vst [vmem:[%s337_s13 + $0x30] sm:$0xff] %v986_v21  ;;  %989 = vst [vmem:[%s337_s13 + $0x38] sm:$0xff] %v987_v22 }
 0x3a4   : > { %1396 = shalt.err (!%p1393_p6)
}
 0x3a5   : > { %s1397_s14 = scalar_lea.hbm %s1764_s10, 1024  ;;  %s1401_s9 = scalar_lea.hbm %s1818_s6, 2048 }
 0x3a6   : > { %p1398_p9 = scmp.ne.s32.totalorder %s1764_s10, %s1397_s14  ;;  %p1402_p11 = scmp.lt.s32.totalorder %s1764_s10, %s1818_s6 }
 0x3a7   : > { %p1403_p3 = scmp.lt.s32.totalorder %s1401_s9, %s1397_s14 }
 0x3a8   : > { %p1399_p12 = pnand %p1398_p9, %p1605_p0 }
 0x3a9   : > { %p1404_p1 = por %p1403_p3, %p1402_p11 }
 0x3aa   : > { %p1400_p13 = pneg %p1399_p12 }
 0x3ac   : > { %p1405_p4 = pnand %p1404_p1, %p1400_p13 }
 0x3ae   : > { %1408 = shalt.err (!%p1405_p4)
}
 0x3af   : > { %1177 = dma.vmem_to_hbm [thread:$0]  (%p1605_p0), %s1766_s15, 1024, %s1764_s10, %s991_s24  }
 0x3b0 PF: > { %s1838_s20 = sld [smem:[#allocation14_spill]]  ;;  %s1019_s29 = sand.u32 1, %s1451_s21  }
 0x3b1   : > { %s1020_s27 = scalar_lea.sflag [#allocation4], %s1019_s29 }
 0x3b6   : > { %p1839_p8 = scmp.ne.s32.totalorder %s1838_s20, 0 }
 0x3b8   : > { %p1191_p5 = pnand %p1125_p10, %p1839_p8 }
 0x3ba   : > { %p1192_p7 = pneg %p1191_p5 }
 0x3bc   : > { %1446 = dma.done.wait (%p1192_p7), %s1020_s27, 1024  }
 0x3bd   : > { %1448 = vsyncadd (%p1192_p7), %s1020_s27, 4294966272  ;;  %s25_s26 = sadd.s32 1, %s1471_s26   ;;  %s1840_s19 = sld [smem:[#allocation16_spill]] }
 0x3be   : > { %p22_p2 = scmp.ge.s32.totalorder %s25_s26, 4   ;;  %s1841_s24 = sld [smem:[#allocation13_spill]] }
 0x3bf   : > { %s1842_s25 = sld [smem:[#allocation15_spill]]  ;;  %s1843_s21 = smov %s1455_s22 }
 0x3c0   : > { %s1844_s22 = smov %s1459_s23  ;;  %24 = sbr.rel (!%p22_p2) target bundleno = 11 (0xb), region = 106 }
 0x3c3   : > { %s1845_s23 = smov %s1840_s19 }
 0x3c5   :  { %1025 = vsyncpa [#allocation3], 1 }
 0x3c6   :  { %1027 = vsyncpa [#allocation3 + $0x1], 1 }
 0x3c7   :  { %1028 = vsyncpa [#allocation6], 1 }
 0x3c8   :  { %1030 = vsyncpa [#allocation6 + $0x1], 1 }
 0x3c9   :  { %1031 = vsyncpa [#allocation4], 1 }
 0x3ca   :  { %1033 = vsyncpa [#allocation4 + $0x1], 1 }

</bundles_post_ra>
